<compile_context>
chip_gen: v7x
topology: tpu7x:2x2x1
jax: 0.10.0
libtpu: 0.0.40
codegen_flags: <defaults>
</compile_context>

<pallas_src>
import jax
import jax.numpy as jnp
from jax import lax
from jax.experimental import pallas as pl
from jax.experimental.pallas import tpu as pltpu

# ---------------------------------------------------------------------------
# Small synthetic config (mirrors cfg in LinearLayperson.__init__)
# ---------------------------------------------------------------------------
N_EMBED = 64        # vocab size == feature dim of `message` (Linear(n_embed, out))
EMBED_SIZE = 32
HIDDEN_SIZE = 32
OUTPUT_SIZE = 8
PAD_IDX = 0
BATCH = 2
SEQ = 8

SUBLANE = 8         # f32 sublane count — pad batch to a multiple of this


# ---------------------------------------------------------------------------
# Fused kernel: LSTM recurrence (pre-projected inputs) + classifier head.
# No grid — everything (a few tens of KiB) lives in one VMEM block set.
# ---------------------------------------------------------------------------
def fused_layperson_kernel(gates_in_ref,   # (T, Bp, 4H)  x_t @ W_ih^T + (b_ih+b_hh)
                           len_ref,        # (Bp, 1)      int32 valid lengths
                           whh_ref,        # (H, 4H)      W_hh^T
                           msg_ref,        # (Bp, n_embed)
                           wm_ref,         # (n_embed, O) W_message^T
                           wh_ref,         # (H, O)       W_hyp^T
                           wz_ref,         # (O, O)       W_merge^T
                           b_head_ref,     # (1, O)       b_message + b_hyp
                           bz_ref,         # (1, O)       b_merge
                           out_ref):       # (Bp, O)      logits
    T = gates_in_ref.shape[0]
    Bp = gates_in_ref.shape[1]
    H = whh_ref.shape[0]

    lengths = len_ref[...]                 # (Bp, 1) int32
    whh = whh_ref[...]                     # (H, 4H) — loaded once, reused every step

    def step(t, carry):
        h, c = carry
        # One matmul on the latency-critical path (input projection is precomputed).
        gates = gates_in_ref[t] + jnp.dot(h, whh,
                                          preferred_element_type=jnp.float32)
        i = jax.nn.sigmoid(gates[:, 0 * H:1 * H])
        f = jax.nn.sigmoid(gates[:, 1 * H:2 * H])
        g = jnp.tanh(gates[:, 2 * H:3 * H])
        o = jax.nn.sigmoid(gates[:, 3 * H:4 * H])
        c_new = f * c + i * g
        h_new = o * jnp.tanh(c_new)
        # Freeze h/c past each row's valid length => pack/pad_packed final hidden.
        valid = t < lengths                # (Bp, 1) bool, broadcasts over H
        return (jnp.where(valid, h_new, h), jnp.where(valid, c_new, c))

    h0 = jnp.zeros((Bp, H), jnp.float32)
    c0 = jnp.zeros((Bp, H), jnp.float32)
    h, _ = lax.fori_loop(0, T, step, (h0, c0), unroll=True)

    # Fused classifier head:
    #   logits = tanh(msg @ Wm^T + h @ Wh^T + (bm + bh)) @ Wz^T + bz
    merged = jnp.tanh(
        jnp.dot(msg_ref[...], wm_ref[...], preferred_element_type=jnp.float32)
        + jnp.dot(h, wh_ref[...], preferred_element_type=jnp.float32)
        + b_head_ref[...])
    out_ref[...] = (jnp.dot(merged, wz_ref[...],
                            preferred_element_type=jnp.float32)
                    + bz_ref[...])


# ---------------------------------------------------------------------------
# One-time parameter preprocessing (done at load time, NOT per forward call).
# ---------------------------------------------------------------------------
def prepare_params(params):
    (embed_w, w_ih, w_hh, b_ih, b_hh, wm, bm, wh, bh, wz, bz) = params
    # Frozen embeddings => pre-project the whole table through the LSTM input
    # projection and fold both LSTM biases in: (vocab, 4H).
    embed_proj = embed_w @ w_ih.T + (b_ih + b_hh)[None, :]
    return dict(
        embed_proj=embed_proj.astype(jnp.float32),
        whh_t=w_hh.T.astype(jnp.float32),          # (H, 4H)
        wm_t=wm.T.astype(jnp.float32),             # (n_embed, O)
        wh_t=wh.T.astype(jnp.float32),             # (H, O)
        wz_t=wz.T.astype(jnp.float32),             # (O, O)
        b_head=(bm + bh)[None, :].astype(jnp.float32),
        bz=bz[None, :].astype(jnp.float32),
    )


# ---------------------------------------------------------------------------
# Forward (thin wrapper: pad batch, gather pre-projected gate inputs, call kernel)
# ---------------------------------------------------------------------------
def forward(message, hypo_input, hypo_lengths, prep):
    B, T = hypo_input.shape
    Bp = ((B + SUBLANE - 1) // SUBLANE) * SUBLANE
    pad = Bp - B

    # Pad batch to the sublane multiple. Padded rows: PAD tokens, length 0
    # (frozen at the zero initial state), zero message — dropped after the kernel.
    ids = jnp.pad(hypo_input, ((0, pad), (0, 0)), constant_values=PAD_IDX)
    lens = jnp.pad(hypo_lengths.astype(jnp.int32), (0, pad))[:, None]   # (Bp, 1)
    msg = jnp.pad(message.astype(jnp.float32), ((0, pad), (0, 0)))      # (Bp, n_embed)

    # Gather time-major pre-projected gate inputs: (T, Bp, 4H).
    # TODO(synk): the per-token row gather stays in plain JAX; pulling it in-kernel
    # would re-introduce a per-row grid (pl.Element gather) for no win at this size.
    gates_in = jnp.take(prep["embed_proj"], ids.T, axis=0)

    O = prep["wz_t"].shape[1]
    logits_p = pl.pallas_call(
        fused_layperson_kernel,
        out_shape=jax.ShapeDtypeStruct((Bp, O), jnp.float32),
    )(gates_in, lens, prep["whh_t"], msg,
      prep["wm_t"], prep["wh_t"], prep["wz_t"],
      prep["b_head"], prep["bz"])
    return logits_p[:B]


forward_jit = jax.jit(forward)


# ---------------------------------------------------------------------------
# Pure-JAX reference (from the original, untransformed parameters)
# ---------------------------------------------------------------------------
def reference_forward(message, hypo_input, hypo_lengths, params):
    (embed_w, w_ih, w_hh, b_ih, b_hh, wm, bm, wh, bh, wz, bz) = params
    x = jnp.take(embed_w, hypo_input, axis=0)                  # (B, T, E)
    B, T, _ = x.shape
    H = w_hh.shape[1]

    def step(carry, t):
        h, c = carry
        gates = x[:, t, :] @ w_ih.T + h @ w_hh.T + b_ih + b_hh
        i, f, g, o = jnp.split(gates, 4, axis=-1)
        i, f, o = jax.nn.sigmoid(i), jax.nn.sigmoid(f), jax.nn.sigmoid(o)
        g = jnp.tanh(g)
        c_new = f * c + i * g
        h_new = o * jnp.tanh(c_new)
        valid = (t < hypo_lengths)[:, None]
        return (jnp.where(valid, h_new, h), jnp.where(valid, c_new, c)), None

    (h, _), _ = jax.lax.scan(step,
                             (jnp.zeros((B, H), jnp.float32),
                              jnp.zeros((B, H), jnp.float32)),
                             jnp.arange(T))
    merged = jnp.tanh(message @ wm.T + bm + h @ wh.T + bh)
    return merged @ wz.T + bz


if __name__ == "__main__":
    key = jax.random.PRNGKey(0)
    keys = jax.random.split(key, 12)
    s = 0.1

    # Parameters (deterministic synthetic init; shapes follow the module).
    embed_w = s * jax.random.normal(keys[0], (N_EMBED, EMBED_SIZE), jnp.float32)
    embed_w = embed_w.at[PAD_IDX].set(0.0)                     # padding_idx row
    w_ih = s * jax.random.normal(keys[1], (4 * HIDDEN_SIZE, EMBED_SIZE), jnp.float32)
    w_hh = s * jax.random.normal(keys[2], (4 * HIDDEN_SIZE, HIDDEN_SIZE), jnp.float32)
    b_ih = s * jax.random.normal(keys[3], (4 * HIDDEN_SIZE,), jnp.float32)
    b_hh = s * jax.random.normal(keys[4], (4 * HIDDEN_SIZE,), jnp.float32)
    wm = s * jax.random.normal(keys[5], (OUTPUT_SIZE, N_EMBED), jnp.float32)
    bm = s * jax.random.normal(keys[6], (OUTPUT_SIZE,), jnp.float32)
    wh = s * jax.random.normal(keys[7], (OUTPUT_SIZE, HIDDEN_SIZE), jnp.float32)
    bh = s * jax.random.normal(keys[8], (OUTPUT_SIZE,), jnp.float32)
    wz = s * jax.random.normal(keys[9], (OUTPUT_SIZE, OUTPUT_SIZE), jnp.float32)
    bz = s * jax.random.normal(keys[10], (OUTPUT_SIZE,), jnp.float32)
    params = (embed_w, w_ih, w_hh, b_ih, b_hh, wm, bm, wh, bh, wz, bz)

    # Inputs: message (B, n_embed) float, hypothesis token ids + lengths.
    message = jax.random.normal(keys[11], (BATCH, N_EMBED), jnp.float32)
    hypo_lengths = jnp.array([SEQ, 5], dtype=jnp.int32)
    hypo_input = jax.random.randint(jax.random.PRNGKey(42), (BATCH, SEQ),
                                    1, N_EMBED, dtype=jnp.int32)
    pos = jnp.arange(SEQ)[None, :]
    hypo_input = jnp.where(pos < hypo_lengths[:, None], hypo_input, PAD_IDX)

    prep = prepare_params(params)          # one-time: transposes, bias fold, pre-proj table
    logits = forward_jit(message, hypo_input, hypo_lengths, prep)
    jax.block_until_ready(logits)

    ref = reference_forward(message, hypo_input, hypo_lengths, params)
    assert logits.shape == (BATCH, OUTPUT_SIZE)
    assert jnp.allclose(logits, ref, rtol=1e-4, atol=1e-4), (logits, ref)

    print("KERNEL_OK")
</pallas_src>

<mosaic_0001>
module attributes {stable_mosaic.version = 11 : i64} {
  func.func @fused_layperson_kernel(%arg0: memref<8x8x128xf32, #tpu.memory_space<vmem>>, %arg1: memref<8x1xi32, #tpu.memory_space<vmem>>, %arg2: memref<32x128xf32, #tpu.memory_space<vmem>>, %arg3: memref<8x64xf32, #tpu.memory_space<vmem>>, %arg4: memref<64x8xf32, #tpu.memory_space<vmem>>, %arg5: memref<32x8xf32, #tpu.memory_space<vmem>>, %arg6: memref<8x8xf32, #tpu.memory_space<vmem>>, %arg7: memref<1x8xf32, #tpu.memory_space<vmem>>, %arg8: memref<1x8xf32, #tpu.memory_space<vmem>>, %arg9: memref<8x8xf32, #tpu.memory_space<vmem>>) attributes {dimension_semantics = [], scalar_prefetch = 0 : i64, scratch_operands = 0 : i64, tpu.core_type = #tpu.core_type<tc>} {
    %c0 = arith.constant 0 : index
    %c0_0 = arith.constant 0 : index
    %0 = vector.load %arg1[%c0, %c0_0] : memref<8x1xi32, #tpu.memory_space<vmem>>, vector<8x1xi32>
    %c0_1 = arith.constant 0 : index
    %c0_2 = arith.constant 0 : index
    %1 = vector.load %arg2[%c0_1, %c0_2] : memref<32x128xf32, #tpu.memory_space<vmem>>, vector<32x128xf32>
    %cst = arith.constant 0.000000e+00 : f32
    %2 = vector.broadcast %cst : f32 to vector<8x32xf32>
    %cst_3 = arith.constant 0.000000e+00 : f32
    %3 = vector.broadcast %cst_3 : f32 to vector<8x32xf32>
    %c0_i32 = arith.constant 0 : i32
    %4 = arith.index_cast %c0_i32 : i32 to index
    %c0_4 = arith.constant 0 : index
    %c0_5 = arith.constant 0 : index
    %5 = vector.load %arg0[%4, %c0_4, %c0_5] : memref<8x8x128xf32, #tpu.memory_space<vmem>>, vector<1x8x128xf32>
    %6 = vector.shape_cast %5 : vector<1x8x128xf32> to vector<8x128xf32>
    %cst_6 = arith.constant dense<0.000000e+00> : vector<8x128xf32>
    %7 = tpu.matmul %2, %1, %cst_6 {dimension_numbers = #tpu.dot_dimension_numbers<[1], [0], [0], [1], [0, 0, 1, 1], [], []>} : vector<8x32xf32>, vector<32x128xf32>, vector<8x128xf32> -> vector<8x128xf32>
    %8 = arith.addf %6, %7 : vector<8x128xf32>
    %9 = vector.extract_strided_slice %8 {offsets = [0, 0], sizes = [8, 32], strides = [1, 1]} : vector<8x128xf32> to vector<8x32xf32>
    %10 = arith.negf %9 : vector<8x32xf32>
    %11 = math.exp %10 : vector<8x32xf32>
    %cst_7 = arith.constant 1.000000e+00 : f32
    %12 = vector.broadcast %cst_7 : f32 to vector<8x32xf32>
    %13 = arith.addf %12, %11 : vector<8x32xf32>
    %14 = arith.divf %12, %13 : vector<8x32xf32>
    %15 = vector.extract_strided_slice %8 {offsets = [0, 32], sizes = [8, 32], strides = [1, 1]} : vector<8x128xf32> to vector<8x32xf32>
    %16 = arith.negf %15 : vector<8x32xf32>
    %17 = math.exp %16 : vector<8x32xf32>
    %cst_8 = arith.constant 1.000000e+00 : f32
    %18 = vector.broadcast %cst_8 : f32 to vector<8x32xf32>
    %19 = arith.addf %18, %17 : vector<8x32xf32>
    %20 = arith.divf %18, %19 : vector<8x32xf32>
    %21 = vector.extract_strided_slice %8 {offsets = [0, 64], sizes = [8, 32], strides = [1, 1]} : vector<8x128xf32> to vector<8x32xf32>
    %22 = math.tanh %21 : vector<8x32xf32>
    %23 = vector.extract_strided_slice %8 {offsets = [0, 96], sizes = [8, 32], strides = [1, 1]} : vector<8x128xf32> to vector<8x32xf32>
    %24 = arith.negf %23 : vector<8x32xf32>
    %25 = math.exp %24 : vector<8x32xf32>
    %cst_9 = arith.constant 1.000000e+00 : f32
    %26 = vector.broadcast %cst_9 : f32 to vector<8x32xf32>
    %27 = arith.addf %26, %25 : vector<8x32xf32>
    %28 = arith.divf %26, %27 : vector<8x32xf32>
    %29 = arith.mulf %20, %3 : vector<8x32xf32>
    %30 = arith.mulf %14, %22 : vector<8x32xf32>
    %31 = arith.addf %29, %30 : vector<8x32xf32>
    %32 = math.tanh %31 : vector<8x32xf32>
    %33 = arith.mulf %28, %32 : vector<8x32xf32>
    %34 = vector.broadcast %c0_i32 : i32 to vector<8x1xi32>
    %35 = arith.cmpi slt, %34, %0 : vector<8x1xi32>
    %36 = vector.shape_cast %35 : vector<8x1xi1> to vector<8x1xi1>
    %37 = vector.broadcast %36 : vector<8x1xi1> to vector<8x32xi1>
    %38 = arith.select %37, %33, %2 : vector<8x32xi1>, vector<8x32xf32>
    %39 = vector.shape_cast %35 : vector<8x1xi1> to vector<8x1xi1>
    %40 = vector.broadcast %39 : vector<8x1xi1> to vector<8x32xi1>
    %41 = arith.select %40, %31, %3 : vector<8x32xi1>, vector<8x32xf32>
    %c1_i32 = arith.constant 1 : i32
    %42 = arith.index_cast %c1_i32 : i32 to index
    %c0_10 = arith.constant 0 : index
    %c0_11 = arith.constant 0 : index
    %43 = vector.load %arg0[%42, %c0_10, %c0_11] : memref<8x8x128xf32, #tpu.memory_space<vmem>>, vector<1x8x128xf32>
    %44 = vector.shape_cast %43 : vector<1x8x128xf32> to vector<8x128xf32>
    %cst_12 = arith.constant dense<0.000000e+00> : vector<8x128xf32>
    %45 = tpu.matmul %38, %1, %cst_12 {dimension_numbers = #tpu.dot_dimension_numbers<[1], [0], [0], [1], [0, 0, 1, 1], [], []>} : vector<8x32xf32>, vector<32x128xf32>, vector<8x128xf32> -> vector<8x128xf32>
    %46 = arith.addf %44, %45 : vector<8x128xf32>
    %47 = vector.extract_strided_slice %46 {offsets = [0, 0], sizes = [8, 32], strides = [1, 1]} : vector<8x128xf32> to vector<8x32xf32>
    %48 = arith.negf %47 : vector<8x32xf32>
    %49 = math.exp %48 : vector<8x32xf32>
    %cst_13 = arith.constant 1.000000e+00 : f32
    %50 = vector.broadcast %cst_13 : f32 to vector<8x32xf32>
    %51 = arith.addf %50, %49 : vector<8x32xf32>
    %52 = arith.divf %50, %51 : vector<8x32xf32>
    %53 = vector.extract_strided_slice %46 {offsets = [0, 32], sizes = [8, 32], strides = [1, 1]} : vector<8x128xf32> to vector<8x32xf32>
    %54 = arith.negf %53 : vector<8x32xf32>
    %55 = math.exp %54 : vector<8x32xf32>
    %cst_14 = arith.constant 1.000000e+00 : f32
    %56 = vector.broadcast %cst_14 : f32 to vector<8x32xf32>
    %57 = arith.addf %56, %55 : vector<8x32xf32>
    %58 = arith.divf %56, %57 : vector<8x32xf32>
    %59 = vector.extract_strided_slice %46 {offsets = [0, 64], sizes = [8, 32], strides = [1, 1]} : vector<8x128xf32> to vector<8x32xf32>
    %60 = math.tanh %59 : vector<8x32xf32>
    %61 = vector.extract_strided_slice %46 {offsets = [0, 96], sizes = [8, 32], strides = [1, 1]} : vector<8x128xf32> to vector<8x32xf32>
    %62 = arith.negf %61 : vector<8x32xf32>
    %63 = math.exp %62 : vector<8x32xf32>
    %cst_15 = arith.constant 1.000000e+00 : f32
    %64 = vector.broadcast %cst_15 : f32 to vector<8x32xf32>
    %65 = arith.addf %64, %63 : vector<8x32xf32>
    %66 = arith.divf %64, %65 : vector<8x32xf32>
    %67 = arith.mulf %58, %41 : vector<8x32xf32>
    %68 = arith.mulf %52, %60 : vector<8x32xf32>
    %69 = arith.addf %67, %68 : vector<8x32xf32>
    %70 = math.tanh %69 : vector<8x32xf32>
    %71 = arith.mulf %66, %70 : vector<8x32xf32>
    %72 = vector.broadcast %c1_i32 : i32 to vector<8x1xi32>
    %73 = arith.cmpi slt, %72, %0 : vector<8x1xi32>
    %74 = vector.shape_cast %73 : vector<8x1xi1> to vector<8x1xi1>
    %75 = vector.broadcast %74 : vector<8x1xi1> to vector<8x32xi1>
    %76 = arith.select %75, %71, %38 : vector<8x32xi1>, vector<8x32xf32>
    %77 = vector.shape_cast %73 : vector<8x1xi1> to vector<8x1xi1>
    %78 = vector.broadcast %77 : vector<8x1xi1> to vector<8x32xi1>
    %79 = arith.select %78, %69, %41 : vector<8x32xi1>, vector<8x32xf32>
    %c2_i32 = arith.constant 2 : i32
    %80 = arith.index_cast %c2_i32 : i32 to index
    %c0_16 = arith.constant 0 : index
    %c0_17 = arith.constant 0 : index
    %81 = vector.load %arg0[%80, %c0_16, %c0_17] : memref<8x8x128xf32, #tpu.memory_space<vmem>>, vector<1x8x128xf32>
    %82 = vector.shape_cast %81 : vector<1x8x128xf32> to vector<8x128xf32>
    %cst_18 = arith.constant dense<0.000000e+00> : vector<8x128xf32>
    %83 = tpu.matmul %76, %1, %cst_18 {dimension_numbers = #tpu.dot_dimension_numbers<[1], [0], [0], [1], [0, 0, 1, 1], [], []>} : vector<8x32xf32>, vector<32x128xf32>, vector<8x128xf32> -> vector<8x128xf32>
    %84 = arith.addf %82, %83 : vector<8x128xf32>
    %85 = vector.extract_strided_slice %84 {offsets = [0, 0], sizes = [8, 32], strides = [1, 1]} : vector<8x128xf32> to vector<8x32xf32>
    %86 = arith.negf %85 : vector<8x32xf32>
    %87 = math.exp %86 : vector<8x32xf32>
    %cst_19 = arith.constant 1.000000e+00 : f32
    %88 = vector.broadcast %cst_19 : f32 to vector<8x32xf32>
    %89 = arith.addf %88, %87 : vector<8x32xf32>
    %90 = arith.divf %88, %89 : vector<8x32xf32>
    %91 = vector.extract_strided_slice %84 {offsets = [0, 32], sizes = [8, 32], strides = [1, 1]} : vector<8x128xf32> to vector<8x32xf32>
    %92 = arith.negf %91 : vector<8x32xf32>
    %93 = math.exp %92 : vector<8x32xf32>
    %cst_20 = arith.constant 1.000000e+00 : f32
    %94 = vector.broadcast %cst_20 : f32 to vector<8x32xf32>
    %95 = arith.addf %94, %93 : vector<8x32xf32>
    %96 = arith.divf %94, %95 : vector<8x32xf32>
    %97 = vector.extract_strided_slice %84 {offsets = [0, 64], sizes = [8, 32], strides = [1, 1]} : vector<8x128xf32> to vector<8x32xf32>
    %98 = math.tanh %97 : vector<8x32xf32>
    %99 = vector.extract_strided_slice %84 {offsets = [0, 96], sizes = [8, 32], strides = [1, 1]} : vector<8x128xf32> to vector<8x32xf32>
    %100 = arith.negf %99 : vector<8x32xf32>
    %101 = math.exp %100 : vector<8x32xf32>
    %cst_21 = arith.constant 1.000000e+00 : f32
    %102 = vector.broadcast %cst_21 : f32 to vector<8x32xf32>
    %103 = arith.addf %102, %101 : vector<8x32xf32>
    %104 = arith.divf %102, %103 : vector<8x32xf32>
    %105 = arith.mulf %96, %79 : vector<8x32xf32>
    %106 = arith.mulf %90, %98 : vector<8x32xf32>
    %107 = arith.addf %105, %106 : vector<8x32xf32>
    %108 = math.tanh %107 : vector<8x32xf32>
    %109 = arith.mulf %104, %108 : vector<8x32xf32>
    %110 = vector.broadcast %c2_i32 : i32 to vector<8x1xi32>
    %111 = arith.cmpi slt, %110, %0 : vector<8x1xi32>
    %112 = vector.shape_cast %111 : vector<8x1xi1> to vector<8x1xi1>
    %113 = vector.broadcast %112 : vector<8x1xi1> to vector<8x32xi1>
    %114 = arith.select %113, %109, %76 : vector<8x32xi1>, vector<8x32xf32>
    %115 = vector.shape_cast %111 : vector<8x1xi1> to vector<8x1xi1>
    %116 = vector.broadcast %115 : vector<8x1xi1> to vector<8x32xi1>
    %117 = arith.select %116, %107, %79 : vector<8x32xi1>, vector<8x32xf32>
    %c3_i32 = arith.constant 3 : i32
    %118 = arith.index_cast %c3_i32 : i32 to index
    %c0_22 = arith.constant 0 : index
    %c0_23 = arith.constant 0 : index
    %119 = vector.load %arg0[%118, %c0_22, %c0_23] : memref<8x8x128xf32, #tpu.memory_space<vmem>>, vector<1x8x128xf32>
    %120 = vector.shape_cast %119 : vector<1x8x128xf32> to vector<8x128xf32>
    %cst_24 = arith.constant dense<0.000000e+00> : vector<8x128xf32>
    %121 = tpu.matmul %114, %1, %cst_24 {dimension_numbers = #tpu.dot_dimension_numbers<[1], [0], [0], [1], [0, 0, 1, 1], [], []>} : vector<8x32xf32>, vector<32x128xf32>, vector<8x128xf32> -> vector<8x128xf32>
    %122 = arith.addf %120, %121 : vector<8x128xf32>
    %123 = vector.extract_strided_slice %122 {offsets = [0, 0], sizes = [8, 32], strides = [1, 1]} : vector<8x128xf32> to vector<8x32xf32>
    %124 = arith.negf %123 : vector<8x32xf32>
    %125 = math.exp %124 : vector<8x32xf32>
    %cst_25 = arith.constant 1.000000e+00 : f32
    %126 = vector.broadcast %cst_25 : f32 to vector<8x32xf32>
    %127 = arith.addf %126, %125 : vector<8x32xf32>
    %128 = arith.divf %126, %127 : vector<8x32xf32>
    %129 = vector.extract_strided_slice %122 {offsets = [0, 32], sizes = [8, 32], strides = [1, 1]} : vector<8x128xf32> to vector<8x32xf32>
    %130 = arith.negf %129 : vector<8x32xf32>
    %131 = math.exp %130 : vector<8x32xf32>
    %cst_26 = arith.constant 1.000000e+00 : f32
    %132 = vector.broadcast %cst_26 : f32 to vector<8x32xf32>
    %133 = arith.addf %132, %131 : vector<8x32xf32>
    %134 = arith.divf %132, %133 : vector<8x32xf32>
    %135 = vector.extract_strided_slice %122 {offsets = [0, 64], sizes = [8, 32], strides = [1, 1]} : vector<8x128xf32> to vector<8x32xf32>
    %136 = math.tanh %135 : vector<8x32xf32>
    %137 = vector.extract_strided_slice %122 {offsets = [0, 96], sizes = [8, 32], strides = [1, 1]} : vector<8x128xf32> to vector<8x32xf32>
    %138 = arith.negf %137 : vector<8x32xf32>
    %139 = math.exp %138 : vector<8x32xf32>
    %cst_27 = arith.constant 1.000000e+00 : f32
    %140 = vector.broadcast %cst_27 : f32 to vector<8x32xf32>
    %141 = arith.addf %140, %139 : vector<8x32xf32>
    %142 = arith.divf %140, %141 : vector<8x32xf32>
    %143 = arith.mulf %134, %117 : vector<8x32xf32>
    %144 = arith.mulf %128, %136 : vector<8x32xf32>
    %145 = arith.addf %143, %144 : vector<8x32xf32>
    %146 = math.tanh %145 : vector<8x32xf32>
    %147 = arith.mulf %142, %146 : vector<8x32xf32>
    %148 = vector.broadcast %c3_i32 : i32 to vector<8x1xi32>
    %149 = arith.cmpi slt, %148, %0 : vector<8x1xi32>
    %150 = vector.shape_cast %149 : vector<8x1xi1> to vector<8x1xi1>
    %151 = vector.broadcast %150 : vector<8x1xi1> to vector<8x32xi1>
    %152 = arith.select %151, %147, %114 : vector<8x32xi1>, vector<8x32xf32>
    %153 = vector.shape_cast %149 : vector<8x1xi1> to vector<8x1xi1>
    %154 = vector.broadcast %153 : vector<8x1xi1> to vector<8x32xi1>
    %155 = arith.select %154, %145, %117 : vector<8x32xi1>, vector<8x32xf32>
    %c4_i32 = arith.constant 4 : i32
    %156 = arith.index_cast %c4_i32 : i32 to index
    %c0_28 = arith.constant 0 : index
    %c0_29 = arith.constant 0 : index
    %157 = vector.load %arg0[%156, %c0_28, %c0_29] : memref<8x8x128xf32, #tpu.memory_space<vmem>>, vector<1x8x128xf32>
    %158 = vector.shape_cast %157 : vector<1x8x128xf32> to vector<8x128xf32>
    %cst_30 = arith.constant dense<0.000000e+00> : vector<8x128xf32>
    %159 = tpu.matmul %152, %1, %cst_30 {dimension_numbers = #tpu.dot_dimension_numbers<[1], [0], [0], [1], [0, 0, 1, 1], [], []>} : vector<8x32xf32>, vector<32x128xf32>, vector<8x128xf32> -> vector<8x128xf32>
    %160 = arith.addf %158, %159 : vector<8x128xf32>
    %161 = vector.extract_strided_slice %160 {offsets = [0, 0], sizes = [8, 32], strides = [1, 1]} : vector<8x128xf32> to vector<8x32xf32>
    %162 = arith.negf %161 : vector<8x32xf32>
    %163 = math.exp %162 : vector<8x32xf32>
    %cst_31 = arith.constant 1.000000e+00 : f32
    %164 = vector.broadcast %cst_31 : f32 to vector<8x32xf32>
    %165 = arith.addf %164, %163 : vector<8x32xf32>
    %166 = arith.divf %164, %165 : vector<8x32xf32>
    %167 = vector.extract_strided_slice %160 {offsets = [0, 32], sizes = [8, 32], strides = [1, 1]} : vector<8x128xf32> to vector<8x32xf32>
    %168 = arith.negf %167 : vector<8x32xf32>
    %169 = math.exp %168 : vector<8x32xf32>
    %cst_32 = arith.constant 1.000000e+00 : f32
    %170 = vector.broadcast %cst_32 : f32 to vector<8x32xf32>
    %171 = arith.addf %170, %169 : vector<8x32xf32>
    %172 = arith.divf %170, %171 : vector<8x32xf32>
    %173 = vector.extract_strided_slice %160 {offsets = [0, 64], sizes = [8, 32], strides = [1, 1]} : vector<8x128xf32> to vector<8x32xf32>
    %174 = math.tanh %173 : vector<8x32xf32>
    %175 = vector.extract_strided_slice %160 {offsets = [0, 96], sizes = [8, 32], strides = [1, 1]} : vector<8x128xf32> to vector<8x32xf32>
    %176 = arith.negf %175 : vector<8x32xf32>
    %177 = math.exp %176 : vector<8x32xf32>
    %cst_33 = arith.constant 1.000000e+00 : f32
    %178 = vector.broadcast %cst_33 : f32 to vector<8x32xf32>
    %179 = arith.addf %178, %177 : vector<8x32xf32>
    %180 = arith.divf %178, %179 : vector<8x32xf32>
    %181 = arith.mulf %172, %155 : vector<8x32xf32>
    %182 = arith.mulf %166, %174 : vector<8x32xf32>
    %183 = arith.addf %181, %182 : vector<8x32xf32>
    %184 = math.tanh %183 : vector<8x32xf32>
    %185 = arith.mulf %180, %184 : vector<8x32xf32>
    %186 = vector.broadcast %c4_i32 : i32 to vector<8x1xi32>
    %187 = arith.cmpi slt, %186, %0 : vector<8x1xi32>
    %188 = vector.shape_cast %187 : vector<8x1xi1> to vector<8x1xi1>
    %189 = vector.broadcast %188 : vector<8x1xi1> to vector<8x32xi1>
    %190 = arith.select %189, %185, %152 : vector<8x32xi1>, vector<8x32xf32>
    %191 = vector.shape_cast %187 : vector<8x1xi1> to vector<8x1xi1>
    %192 = vector.broadcast %191 : vector<8x1xi1> to vector<8x32xi1>
    %193 = arith.select %192, %183, %155 : vector<8x32xi1>, vector<8x32xf32>
    %c5_i32 = arith.constant 5 : i32
    %194 = arith.index_cast %c5_i32 : i32 to index
    %c0_34 = arith.constant 0 : index
    %c0_35 = arith.constant 0 : index
    %195 = vector.load %arg0[%194, %c0_34, %c0_35] : memref<8x8x128xf32, #tpu.memory_space<vmem>>, vector<1x8x128xf32>
    %196 = vector.shape_cast %195 : vector<1x8x128xf32> to vector<8x128xf32>
    %cst_36 = arith.constant dense<0.000000e+00> : vector<8x128xf32>
    %197 = tpu.matmul %190, %1, %cst_36 {dimension_numbers = #tpu.dot_dimension_numbers<[1], [0], [0], [1], [0, 0, 1, 1], [], []>} : vector<8x32xf32>, vector<32x128xf32>, vector<8x128xf32> -> vector<8x128xf32>
    %198 = arith.addf %196, %197 : vector<8x128xf32>
    %199 = vector.extract_strided_slice %198 {offsets = [0, 0], sizes = [8, 32], strides = [1, 1]} : vector<8x128xf32> to vector<8x32xf32>
    %200 = arith.negf %199 : vector<8x32xf32>
    %201 = math.exp %200 : vector<8x32xf32>
    %cst_37 = arith.constant 1.000000e+00 : f32
    %202 = vector.broadcast %cst_37 : f32 to vector<8x32xf32>
    %203 = arith.addf %202, %201 : vector<8x32xf32>
    %204 = arith.divf %202, %203 : vector<8x32xf32>
    %205 = vector.extract_strided_slice %198 {offsets = [0, 32], sizes = [8, 32], strides = [1, 1]} : vector<8x128xf32> to vector<8x32xf32>
    %206 = arith.negf %205 : vector<8x32xf32>
    %207 = math.exp %206 : vector<8x32xf32>
    %cst_38 = arith.constant 1.000000e+00 : f32
    %208 = vector.broadcast %cst_38 : f32 to vector<8x32xf32>
    %209 = arith.addf %208, %207 : vector<8x32xf32>
    %210 = arith.divf %208, %209 : vector<8x32xf32>
    %211 = vector.extract_strided_slice %198 {offsets = [0, 64], sizes = [8, 32], strides = [1, 1]} : vector<8x128xf32> to vector<8x32xf32>
    %212 = math.tanh %211 : vector<8x32xf32>
    %213 = vector.extract_strided_slice %198 {offsets = [0, 96], sizes = [8, 32], strides = [1, 1]} : vector<8x128xf32> to vector<8x32xf32>
    %214 = arith.negf %213 : vector<8x32xf32>
    %215 = math.exp %214 : vector<8x32xf32>
    %cst_39 = arith.constant 1.000000e+00 : f32
    %216 = vector.broadcast %cst_39 : f32 to vector<8x32xf32>
    %217 = arith.addf %216, %215 : vector<8x32xf32>
    %218 = arith.divf %216, %217 : vector<8x32xf32>
    %219 = arith.mulf %210, %193 : vector<8x32xf32>
    %220 = arith.mulf %204, %212 : vector<8x32xf32>
    %221 = arith.addf %219, %220 : vector<8x32xf32>
    %222 = math.tanh %221 : vector<8x32xf32>
    %223 = arith.mulf %218, %222 : vector<8x32xf32>
    %224 = vector.broadcast %c5_i32 : i32 to vector<8x1xi32>
    %225 = arith.cmpi slt, %224, %0 : vector<8x1xi32>
    %226 = vector.shape_cast %225 : vector<8x1xi1> to vector<8x1xi1>
    %227 = vector.broadcast %226 : vector<8x1xi1> to vector<8x32xi1>
    %228 = arith.select %227, %223, %190 : vector<8x32xi1>, vector<8x32xf32>
    %229 = vector.shape_cast %225 : vector<8x1xi1> to vector<8x1xi1>
    %230 = vector.broadcast %229 : vector<8x1xi1> to vector<8x32xi1>
    %231 = arith.select %230, %221, %193 : vector<8x32xi1>, vector<8x32xf32>
    %c6_i32 = arith.constant 6 : i32
    %232 = arith.index_cast %c6_i32 : i32 to index
    %c0_40 = arith.constant 0 : index
    %c0_41 = arith.constant 0 : index
    %233 = vector.load %arg0[%232, %c0_40, %c0_41] : memref<8x8x128xf32, #tpu.memory_space<vmem>>, vector<1x8x128xf32>
    %234 = vector.shape_cast %233 : vector<1x8x128xf32> to vector<8x128xf32>
    %cst_42 = arith.constant dense<0.000000e+00> : vector<8x128xf32>
    %235 = tpu.matmul %228, %1, %cst_42 {dimension_numbers = #tpu.dot_dimension_numbers<[1], [0], [0], [1], [0, 0, 1, 1], [], []>} : vector<8x32xf32>, vector<32x128xf32>, vector<8x128xf32> -> vector<8x128xf32>
    %236 = arith.addf %234, %235 : vector<8x128xf32>
    %237 = vector.extract_strided_slice %236 {offsets = [0, 0], sizes = [8, 32], strides = [1, 1]} : vector<8x128xf32> to vector<8x32xf32>
    %238 = arith.negf %237 : vector<8x32xf32>
    %239 = math.exp %238 : vector<8x32xf32>
    %cst_43 = arith.constant 1.000000e+00 : f32
    %240 = vector.broadcast %cst_43 : f32 to vector<8x32xf32>
    %241 = arith.addf %240, %239 : vector<8x32xf32>
    %242 = arith.divf %240, %241 : vector<8x32xf32>
    %243 = vector.extract_strided_slice %236 {offsets = [0, 32], sizes = [8, 32], strides = [1, 1]} : vector<8x128xf32> to vector<8x32xf32>
    %244 = arith.negf %243 : vector<8x32xf32>
    %245 = math.exp %244 : vector<8x32xf32>
    %cst_44 = arith.constant 1.000000e+00 : f32
    %246 = vector.broadcast %cst_44 : f32 to vector<8x32xf32>
    %247 = arith.addf %246, %245 : vector<8x32xf32>
    %248 = arith.divf %246, %247 : vector<8x32xf32>
    %249 = vector.extract_strided_slice %236 {offsets = [0, 64], sizes = [8, 32], strides = [1, 1]} : vector<8x128xf32> to vector<8x32xf32>
    %250 = math.tanh %249 : vector<8x32xf32>
    %251 = vector.extract_strided_slice %236 {offsets = [0, 96], sizes = [8, 32], strides = [1, 1]} : vector<8x128xf32> to vector<8x32xf32>
    %252 = arith.negf %251 : vector<8x32xf32>
    %253 = math.exp %252 : vector<8x32xf32>
    %cst_45 = arith.constant 1.000000e+00 : f32
    %254 = vector.broadcast %cst_45 : f32 to vector<8x32xf32>
    %255 = arith.addf %254, %253 : vector<8x32xf32>
    %256 = arith.divf %254, %255 : vector<8x32xf32>
    %257 = arith.mulf %248, %231 : vector<8x32xf32>
    %258 = arith.mulf %242, %250 : vector<8x32xf32>
    %259 = arith.addf %257, %258 : vector<8x32xf32>
    %260 = math.tanh %259 : vector<8x32xf32>
    %261 = arith.mulf %256, %260 : vector<8x32xf32>
    %262 = vector.broadcast %c6_i32 : i32 to vector<8x1xi32>
    %263 = arith.cmpi slt, %262, %0 : vector<8x1xi32>
    %264 = vector.shape_cast %263 : vector<8x1xi1> to vector<8x1xi1>
    %265 = vector.broadcast %264 : vector<8x1xi1> to vector<8x32xi1>
    %266 = arith.select %265, %261, %228 : vector<8x32xi1>, vector<8x32xf32>
    %267 = vector.shape_cast %263 : vector<8x1xi1> to vector<8x1xi1>
    %268 = vector.broadcast %267 : vector<8x1xi1> to vector<8x32xi1>
    %269 = arith.select %268, %259, %231 : vector<8x32xi1>, vector<8x32xf32>
    %c7_i32 = arith.constant 7 : i32
    %270 = arith.index_cast %c7_i32 : i32 to index
    %c0_46 = arith.constant 0 : index
    %c0_47 = arith.constant 0 : index
    %271 = vector.load %arg0[%270, %c0_46, %c0_47] : memref<8x8x128xf32, #tpu.memory_space<vmem>>, vector<1x8x128xf32>
    %272 = vector.shape_cast %271 : vector<1x8x128xf32> to vector<8x128xf32>
    %cst_48 = arith.constant dense<0.000000e+00> : vector<8x128xf32>
    %273 = tpu.matmul %266, %1, %cst_48 {dimension_numbers = #tpu.dot_dimension_numbers<[1], [0], [0], [1], [0, 0, 1, 1], [], []>} : vector<8x32xf32>, vector<32x128xf32>, vector<8x128xf32> -> vector<8x128xf32>
    %274 = arith.addf %272, %273 : vector<8x128xf32>
    %275 = vector.extract_strided_slice %274 {offsets = [0, 0], sizes = [8, 32], strides = [1, 1]} : vector<8x128xf32> to vector<8x32xf32>
    %276 = arith.negf %275 : vector<8x32xf32>
    %277 = math.exp %276 : vector<8x32xf32>
    %cst_49 = arith.constant 1.000000e+00 : f32
    %278 = vector.broadcast %cst_49 : f32 to vector<8x32xf32>
    %279 = arith.addf %278, %277 : vector<8x32xf32>
    %280 = arith.divf %278, %279 : vector<8x32xf32>
    %281 = vector.extract_strided_slice %274 {offsets = [0, 32], sizes = [8, 32], strides = [1, 1]} : vector<8x128xf32> to vector<8x32xf32>
    %282 = arith.negf %281 : vector<8x32xf32>
    %283 = math.exp %282 : vector<8x32xf32>
    %cst_50 = arith.constant 1.000000e+00 : f32
    %284 = vector.broadcast %cst_50 : f32 to vector<8x32xf32>
    %285 = arith.addf %284, %283 : vector<8x32xf32>
    %286 = arith.divf %284, %285 : vector<8x32xf32>
    %287 = vector.extract_strided_slice %274 {offsets = [0, 64], sizes = [8, 32], strides = [1, 1]} : vector<8x128xf32> to vector<8x32xf32>
    %288 = math.tanh %287 : vector<8x32xf32>
    %289 = vector.extract_strided_slice %274 {offsets = [0, 96], sizes = [8, 32], strides = [1, 1]} : vector<8x128xf32> to vector<8x32xf32>
    %290 = arith.negf %289 : vector<8x32xf32>
    %291 = math.exp %290 : vector<8x32xf32>
    %cst_51 = arith.constant 1.000000e+00 : f32
    %292 = vector.broadcast %cst_51 : f32 to vector<8x32xf32>
    %293 = arith.addf %292, %291 : vector<8x32xf32>
    %294 = arith.divf %292, %293 : vector<8x32xf32>
    %295 = arith.mulf %286, %269 : vector<8x32xf32>
    %296 = arith.mulf %280, %288 : vector<8x32xf32>
    %297 = arith.addf %295, %296 : vector<8x32xf32>
    %298 = math.tanh %297 : vector<8x32xf32>
    %299 = arith.mulf %294, %298 : vector<8x32xf32>
    %300 = vector.broadcast %c7_i32 : i32 to vector<8x1xi32>
    %301 = arith.cmpi slt, %300, %0 : vector<8x1xi32>
    %302 = vector.shape_cast %301 : vector<8x1xi1> to vector<8x1xi1>
    %303 = vector.broadcast %302 : vector<8x1xi1> to vector<8x32xi1>
    %304 = arith.select %303, %299, %266 : vector<8x32xi1>, vector<8x32xf32>
    %305 = vector.shape_cast %301 : vector<8x1xi1> to vector<8x1xi1>
    %306 = vector.broadcast %305 : vector<8x1xi1> to vector<8x32xi1>
    %307 = arith.select %306, %297, %269 : vector<8x32xi1>, vector<8x32xf32>
    %c8_i32 = arith.constant 8 : i32
    %c0_52 = arith.constant 0 : index
    %c0_53 = arith.constant 0 : index
    %308 = vector.load %arg3[%c0_52, %c0_53] : memref<8x64xf32, #tpu.memory_space<vmem>>, vector<8x64xf32>
    %c0_54 = arith.constant 0 : index
    %c0_55 = arith.constant 0 : index
    %309 = vector.load %arg4[%c0_54, %c0_55] : memref<64x8xf32, #tpu.memory_space<vmem>>, vector<64x8xf32>
    %cst_56 = arith.constant dense<0.000000e+00> : vector<8x8xf32>
    %310 = tpu.matmul %308, %309, %cst_56 {dimension_numbers = #tpu.dot_dimension_numbers<[1], [0], [0], [1], [0, 0, 1, 1], [], []>} : vector<8x64xf32>, vector<64x8xf32>, vector<8x8xf32> -> vector<8x8xf32>
    %c0_57 = arith.constant 0 : index
    %c0_58 = arith.constant 0 : index
    %311 = vector.load %arg5[%c0_57, %c0_58] : memref<32x8xf32, #tpu.memory_space<vmem>>, vector<32x8xf32>
    %cst_59 = arith.constant dense<0.000000e+00> : vector<8x8xf32>
    %312 = tpu.matmul %304, %311, %cst_59 {dimension_numbers = #tpu.dot_dimension_numbers<[1], [0], [0], [1], [0, 0, 1, 1], [], []>} : vector<8x32xf32>, vector<32x8xf32>, vector<8x8xf32> -> vector<8x8xf32>
    %313 = arith.addf %310, %312 : vector<8x8xf32>
    %c0_60 = arith.constant 0 : index
    %c0_61 = arith.constant 0 : index
    %314 = vector.load %arg7[%c0_60, %c0_61] : memref<1x8xf32, #tpu.memory_space<vmem>>, vector<1x8xf32>
    %315 = vector.broadcast %314 : vector<1x8xf32> to vector<8x8xf32>
    %316 = arith.addf %313, %315 : vector<8x8xf32>
    %317 = math.tanh %316 : vector<8x8xf32>
    %c0_62 = arith.constant 0 : index
    %c0_63 = arith.constant 0 : index
    %318 = vector.load %arg6[%c0_62, %c0_63] : memref<8x8xf32, #tpu.memory_space<vmem>>, vector<8x8xf32>
    %cst_64 = arith.constant dense<0.000000e+00> : vector<8x8xf32>
    %319 = tpu.matmul %317, %318, %cst_64 {dimension_numbers = #tpu.dot_dimension_numbers<[1], [0], [0], [1], [0, 0, 1, 1], [], []>} : vector<8x8xf32>, vector<8x8xf32>, vector<8x8xf32> -> vector<8x8xf32>
    %c0_65 = arith.constant 0 : index
    %c0_66 = arith.constant 0 : index
    %320 = vector.load %arg8[%c0_65, %c0_66] : memref<1x8xf32, #tpu.memory_space<vmem>>, vector<1x8xf32>
    %321 = vector.broadcast %320 : vector<1x8xf32> to vector<8x8xf32>
    %322 = arith.addf %319, %321 : vector<8x8xf32>
    %c0_67 = arith.constant 0 : index
    %c0_68 = arith.constant 0 : index
    %323 = vector.load %arg9[%c0_67, %c0_68] : memref<8x8xf32, #tpu.memory_space<vmem>>, vector<8x8xf32>
    tpu.vector_store %arg9[%c0_67, %c0_68], %322 {strides = array<i32>} : memref<8x8xf32, #tpu.memory_space<vmem>>, vector<8x8xf32>,
    return
  }
}

</mosaic_0001>

<bundles_post_ra>
// kernel: forward.1
= control target key start
LH: loop header
LB: loop body
LE: loop exit
PB: predicated region body
PF: predicated region fallthrough
CT: control target
= control target key end

     0   :  { %v1518_v0 = vmov 0.0|0.0   ;;  %vm1519_vm0 = vmmov 0   ;;  %v1520_v4 = vmov 0.0   ;;  %v1521_v8 = vmov 0   ;;  %s1522_s20 = smov 64   ;;  %s1808_s2 = inlined_call_operand.vmem [shape: f32[32,128], index: 2, kind: input, shape index: {}]   ;;  %s1809_s1 = inlined_call_operand.vmem [shape: s32[8,1], index: 1, kind: input, shape index: {}]   ;;  %s1810_s0 = inlined_call_operand.vmem [shape: f32[8,8,128], index: 0, kind: input, shape index: {}]   ;;  %s1811_s4 = inlined_call_operand.vmem [shape: f32[64,8], index: 4, kind: input, shape index: {}]   ;;  %s1812_s5 = inlined_call_operand.vmem [shape: f32[32,8], index: 5, kind: input, shape index: {}]   ;;  %s1813_s3 = inlined_call_operand.vmem [shape: f32[8,64], index: 3, kind: input, shape index: {}]   ;;  %s1814_s6 = inlined_call_operand.vmem [shape: f32[8,8], index: 6, kind: input, shape index: {}]   ;;  %s1815_s7 = inlined_call_operand.vmem [shape: f32[1,8], index: 7, kind: input, shape index: {}]   ;;  %s1816_s8 = inlined_call_operand.vmem [shape: f32[1,8], index: 8, kind: input, shape index: {}]   ;;  %s1817_s9 = inlined_call_operand.vmem [shape: f32[8,8], index: 9, kind: output, shape index: {}]  }
   0x1   :  { %1378 = vmatprep.subr.bf16.mxu0 %v1518_v0  ;;  %v33_v1 = vld [vmem:[%s1808_s2] sm:$0xff]  ;;  %v34_v2 = vld [vmem:[%s1808_s2 + $0x8] sm:$0xff]  ;;  %v35_v3 = vld [vmem:[%s1808_s2 + $0x10] sm:$0xff]  ;;  %1263 = vmatprep.mubr.msk.f32.mxu0 %vm1519_vm0, %v1520_v4  ;;  %vm38_vm3 = vcmask 261120  }
   0x2   :  { %v1586_v5 = vpack.c.bf16 %v34_v2, %v33_v1  ;;  %v36_v6 = vld [vmem:[%s1808_s2 + $0x18] sm:$0xff]  ;;  %1384 = vmatprep.subr.bf16.mxu1 %v1518_v0  ;;  %1274 = vmatprep.mubr.msk.f32.mxu1 %vm1519_vm0, %v1520_v4  ;;  %v1615_v9 = vld [vmem:[%s1809_s1] sm:$0xff]  ;;  %s1523_s1 = smov 32   ;;  %v1173_v31 = vld [vmem:[%s1810_s0 + $0x8] sm:$0xff] }
   0x3   :  { %v1595_v7 = vpack.c.bf16 %v36_v6, %v35_v3  ;;  %1450 = vset.pattern.permute.xlu1 %v1521_v8  ;;  %1451 = vset.pattern.permute.xlu0 %v1521_v8  ;;  %vm137_vm1 = vcmp.gt.s32.totalorder %v1615_v9, 0  ;;  %v37_v11 = vld [vmem:[%s1810_s0] sm:$0xff]  ;;  %vm247_vm4 = vcmp.gt.s32.totalorder %v1615_v9, 1  ;;  %v1176_v53 = vld [vmem:[%s1810_s0 + $0x10] sm:$0xff]  ;;  %vm357_vm6 = vcmp.gt.s32.totalorder %v1615_v9, 2 }
   0x4   :  { %1380 = vmatpush3.bf16.msra.mxu0 %v1586_v5  ;;  %1386 = vmatpush3.bf16.msra.mxu1 %v1586_v5  ;;  %v138_v10 = vsel %vm137_vm1, 1, %v1521_v8  ;;  %v248_v36 = vsel %vm247_vm4, 1, %v1521_v8  ;;  %v358_v58 = vsel %vm357_vm6, 1, %v1521_v8  ;;  %vm467_vm8 = vcmp.gt.s32.totalorder %v1615_v9, 3 }
   0x5   :  { %1381 = vmatprep.subr.bf16.mxu0 %v1518_v0  ;;  %1387 = vmatprep.subr.bf16.mxu1 %v1518_v0  ;;  %vm577_vm10 = vcmp.gt.s32.totalorder %v1615_v9, 4  ;;  %vm687_vm12 = vcmp.gt.s32.totalorder %v1615_v9, 5  ;;  %vm797_vm14 = vcmp.gt.s32.totalorder %v1615_v9, 6  ;;  %vm907_vm1 = vcmp.gt.s32.totalorder %v1615_v9, 7 }
   0x6   :  { %140 = vperm.xlu1 %1450, %v138_v10  }
   0x8   :  { %1383 = vmatpush3.bf16.msra.mxu0 %v1595_v7  ;;  %1389 = vmatpush3.bf16.msra.mxu1 %v1595_v7 }
   0x9   :  { %1390 = vmatprep.subr.bf16.mxu0 %v1518_v0  ;;  %1396 = vmatprep.subr.bf16.mxu1 %v1518_v0 }
   0xb   :  { %1264 = vmatmul.mubr.f32.vlgmr.msra.gmra.mrb[0].mxu0 %v1520_v4 }
   0xc   :  { %1392 = vmatpush3.bf16.msra.mxu0 %v1586_v5  ;;  %1285 = vmatprep.mubr.msk.f32.mxu0 %vm1519_vm0, %v1520_v4 }
   0xd   :  { %1393 = vmatprep.subr.bf16.mxu0 %v1518_v0 }
  0x10   :  { %1395 = vmatpush3.bf16.msra.mxu0 %v1595_v7 }
  0x11   :  { %1402 = vmatprep.subr.bf16.mxu0 %v1518_v0 }
  0x85   :  { %v141_v26 = vpop.permute.xlu1 %140 }
  0x86   :  { %vm142_vm2 = vcmp.eq.s32.totalorder %v141_v26, 1 }
  0xde   :  { %v108_v12 = vpop.f32.mrb[0].mxu0 }
  0xdf   :  { %v112_v13 = vadd.f32 %v108_v12, %v37_v11  ;;  %v1265_v14 = vpop.f32.mrb[1].mxu0 }
  0xe1   :  { %1452 = vtanh.f32 %v112_v13  ;;  %v1172_v16 = vmul.f32 -1.442695, %v112_v13 }
  0xe3   :  { %1454 = vpow2.f32 %v1172_v16 }
  0xeb   :  { %v1453_v15 = vpop.eup %1452 }
  0xec   :  { %122 = vrot.lane.b32.xlu0 %v1453_v15, %s1522_s20 }
  0xed   :  { %v1455_v17 = vpop.eup %1454 }
  0xee   :  { %v116_v18 = vadd.f32 1.0, %v1455_v17  ;;  %v1179_v17 = vld [vmem:[%s1810_s0 + $0x18] sm:$0xff] }
  0xf0   :  { %1456 = vrcp.f32 %v116_v18 }
  0xfa   :  { %v1457_v19 = vpop.eup %1456 }
  0xfb   :  { %v120_v22 = vmul.f32 0.0, %v1457_v19 }
 0x15e   :  { %v123_v20 = vpop.permute.xlu0 %122 }
 0x15f   :  { %v125_v21 = vmul.f32 %v1457_v19, %v123_v20 }
 0x161   :  { %127 = vrot.lane.b32.xlu0 %v125_v21, %s1523_s1 }
 0x1d3   :  { %v128_v23 = vpop.permute.xlu0 %127 }
 0x1d4   :  { %v130_v24 = vadd.f32 %v128_v23, %v120_v22  ;;  %v468_v22 = vsel %vm467_vm8, 1, %v1521_v8 }
 0x1d6   :  { %1458 = vtanh.f32 %v130_v24  ;;  %v144_v43 = vsel %vm142_vm2, %v130_v24, 0.0 }
 0x1e0   :  { %v1459_v25 = vpop.eup %1458 }
 0x1e1   :  { %133 = vrot.lane.b32.xlu1 %v1459_v25, %s1522_s20 }
 0x253   :  { %v134_v27 = vpop.permute.xlu1 %133 }
 0x254   :  { %v136_v28 = vmul.f32 %v1457_v19, %v134_v27 }
 0x256   :  { %v143_v29 = vsel %vm142_vm2, %v136_v28, 0.0  ;;  %vm1002_vm2 = vcmask 523264  }
 0x257   :  { %148 = vrot.lane.b32.xlu0 %v143_v29, %s1523_s1 }
 0x2c9   :  { %v149_v30 = vpop.permute.xlu0 %148 }
 0x2ca   :  { %1275 = vmatmul.mubr.msk.f32.vlgmr.msra.gmra.mrb[0].mxu1 %vm38_vm3, %v149_v30 }
 0x2cb   :  { %1398 = vmatpush3.bf16.msra.mxu1 %v1586_v5  ;;  %1296 = vmatprep.mubr.msk.f32.mxu1 %vm1519_vm0, %v1520_v4 }
 0x2cc   :  { %1399 = vmatprep.subr.bf16.mxu1 %v1518_v0 }
 0x2cf   :  { %1401 = vmatpush3.bf16.msra.mxu1 %v1595_v7 }
 0x2d0   :  { %1408 = vmatprep.subr.bf16.mxu1 %v1518_v0 }
 0x39d   :  { %v218_v32 = vpop.f32.mrb[0].mxu1 }
 0x39e   :  { %v222_v33 = vadd.f32 %v1173_v31, %v218_v32  ;;  %v1276_v34 = vpop.f32.mrb[1].mxu1 }
 0x3a0   :  { %1460 = vtanh.f32 %v222_v33  ;;  %v1175_v37 = vmul.f32 -1.442695, %v222_v33 }
 0x3a2   :  { %1462 = vpow2.f32 %v1175_v37 }
 0x3aa   :  { %v1461_v35 = vpop.eup %1460 }
 0x3ab   :  { %232 = vrot.lane.b32.xlu1 %v1461_v35, %s1522_s20 }
 0x3ac   :  { %v1463_v38 = vpop.eup %1462 }
 0x3ad   :  { %v226_v39 = vadd.f32 1.0, %v1463_v38 }
 0x3af   :  { %250 = vperm.xlu1 %1450, %v248_v36   ;;  %1464 = vrcp.f32 %v226_v39  ;;  %v1182_v39 = vld [vmem:[%s1810_s0 + $0x20] sm:$0xff] }
 0x3b9   :  { %v1465_v40 = vpop.eup %1464 }
 0x3ba   :  { %v230_v44 = vmul.f32 %v1465_v40, %v144_v43 }
 0x41d   :  { %v233_v41 = vpop.permute.xlu1 %232 }
 0x41e   :  { %v235_v42 = vmul.f32 %v1465_v40, %v233_v41 }
 0x420   :  { %237 = vrot.lane.b32.xlu0 %v235_v42, %s1523_s1 }
 0x42e   :  { %v251_v48 = vpop.permute.xlu1 %250 }
 0x42f   :  { %vm252_vm5 = vcmp.eq.s32.totalorder %v251_v48, 1 }
 0x492   :  { %v238_v45 = vpop.permute.xlu0 %237 }
 0x493   :  { %v240_v46 = vadd.f32 %v238_v45, %v230_v44  ;;  %v578_v44 = vsel %vm577_vm10, 1, %v1521_v8 }
 0x495   :  { %1466 = vtanh.f32 %v240_v46  ;;  %v254_v2 = vsel %vm252_vm5, %v240_v46, %v144_v43 }
 0x49f   :  { %v1467_v47 = vpop.eup %1466 }
 0x4a0   :  { %243 = vrot.lane.b32.xlu0 %v1467_v47, %s1522_s20 }
 0x512   :  { %v244_v49 = vpop.permute.xlu0 %243 }
 0x513   :  { %v246_v50 = vmul.f32 %v1465_v40, %v244_v49 }
 0x515   :  { %v253_v51 = vsel %vm252_vm5, %v246_v50, %v143_v29  ;;  %vm1093_vm5 = vcmask 64512  }
 0x516   :  { %258 = vrot.lane.b32.xlu1 %v253_v51, %s1523_s1 }
 0x588   :  { %v259_v52 = vpop.permute.xlu1 %258 }
 0x589   :  { %1286 = vmatmul.mubr.msk.f32.vlgmr.msra.gmra.mrb[2].mxu0 %vm38_vm3, %v259_v52 }
 0x58a   :  { %1404 = vmatpush3.bf16.msra.mxu0 %v1586_v5  ;;  %1307 = vmatprep.mubr.msk.f32.mxu0 %vm1519_vm0, %v1520_v4 }
 0x58b   :  { %1405 = vmatprep.subr.bf16.mxu0 %v1518_v0 }
 0x58e   :  { %1407 = vmatpush3.bf16.msra.mxu0 %v1595_v7 }
 0x58f   :  { %1414 = vmatprep.subr.bf16.mxu0 %v1518_v0 }
 0x65c   :  { %v328_v54 = vpop.f32.mrb[2].mxu0 }
 0x65d   :  { %v332_v55 = vadd.f32 %v1176_v53, %v328_v54  ;;  %v1287_v56 = vpop.f32.mrb[3].mxu0 }
 0x65f   :  { %1468 = vtanh.f32 %v332_v55  ;;  %v1178_v59 = vmul.f32 -1.442695, %v332_v55 }
 0x661   :  { %1470 = vpow2.f32 %v1178_v59 }
 0x669   :  { %v1469_v57 = vpop.eup %1468 }
 0x66a   :  { %342 = vrot.lane.b32.xlu0 %v1469_v57, %s1522_s20 }
 0x66b   :  { %v1471_v60 = vpop.eup %1470 }
 0x66c   :  { %v336_v61 = vadd.f32 1.0, %v1471_v60 }
 0x66e   :  { %360 = vperm.xlu0 %1451, %v358_v58   ;;  %1472 = vrcp.f32 %v336_v61  ;;  %v1185_v61 = vld [vmem:[%s1810_s0 + $0x28] sm:$0xff] }
 0x678   :  { %v1473_v62 = vpop.eup %1472 }
 0x679   :  { %v340_v3 = vmul.f32 %v1473_v62, %v254_v2 }
 0x6dc   :  { %v343_v63 = vpop.permute.xlu0 %342 }
 0x6dd   :  { %v345_v1 = vmul.f32 %v1473_v62, %v343_v63 }
 0x6df   :  { %347 = vrot.lane.b32.xlu1 %v345_v1, %s1523_s1 }
 0x6ed   :  { %v361_v12 = vpop.permute.xlu0 %360 }
 0x6ee   :  { %vm362_vm7 = vcmp.eq.s32.totalorder %v361_v12, 1 }
 0x751   :  { %v348_v6 = vpop.permute.xlu1 %347 }
 0x752   :  { %v350_v10 = vadd.f32 %v348_v6, %v340_v3 }
 0x754   :  { %1474 = vtanh.f32 %v350_v10  ;;  %v364_v29 = vsel %vm362_vm7, %v350_v10, %v254_v2  ;;  %v688_v2 = vsel %vm687_vm12, 1, %v1521_v8 }
 0x75e   :  { %v1475_v11 = vpop.eup %1474 }
 0x75f   :  { %353 = vrot.lane.b32.xlu1 %v1475_v11, %s1522_s20 }
 0x7d1   :  { %v354_v13 = vpop.permute.xlu1 %353 }
 0x7d2   :  { %v356_v14 = vmul.f32 %v1473_v62, %v354_v13 }
 0x7d4   :  { %v363_v15 = vsel %vm362_vm7, %v356_v14, %v253_v51 }
 0x7d5   :  { %368 = vrot.lane.b32.xlu1 %v363_v15, %s1523_s1 }
 0x847   :  { %v369_v16 = vpop.permute.xlu1 %368 }
 0x848   :  { %1297 = vmatmul.mubr.msk.f32.vlgmr.msra.gmra.mrb[2].mxu1 %vm38_vm3, %v369_v16 }
 0x849   :  { %1410 = vmatpush3.bf16.msra.mxu1 %v1586_v5  ;;  %1318 = vmatprep.mubr.msk.f32.mxu1 %vm1519_vm0, %v1520_v4 }
 0x84a   :  { %1411 = vmatprep.subr.bf16.mxu1 %v1518_v0 }
 0x84d   :  { %1413 = vmatpush3.bf16.msra.mxu1 %v1595_v7 }
 0x84e   :  { %1420 = vmatprep.subr.bf16.mxu1 %v1518_v0 }
 0x91b   :  { %v438_v18 = vpop.f32.mrb[2].mxu1 }
 0x91c   :  { %v442_v19 = vadd.f32 %v1179_v17, %v438_v18  ;;  %v1298_v20 = vpop.f32.mrb[3].mxu1 }
 0x91e   :  { %1476 = vtanh.f32 %v442_v19  ;;  %v1181_v23 = vmul.f32 -1.442695, %v442_v19 }
 0x920   :  { %1478 = vpow2.f32 %v1181_v23  ;;  %v1188_v23 = vld [vmem:[%s1810_s0 + $0x30] sm:$0xff] }
 0x928   :  { %v1477_v21 = vpop.eup %1476 }
 0x929   :  { %452 = vrot.lane.b32.xlu0 %v1477_v21, %s1522_s20 }
 0x92a   :  { %v1479_v24 = vpop.eup %1478 }
 0x92b   :  { %v446_v25 = vadd.f32 1.0, %v1479_v24 }
 0x92d   :  { %470 = vperm.xlu0 %1451, %v468_v22   ;;  %1480 = vrcp.f32 %v446_v25 }
 0x937   :  { %v1481_v26 = vpop.eup %1480 }
 0x938   :  { %v450_v30 = vmul.f32 %v1481_v26, %v364_v29 }
 0x99b   :  { %v453_v27 = vpop.permute.xlu0 %452 }
 0x99c   :  { %v455_v28 = vmul.f32 %v1481_v26, %v453_v27 }
 0x99e   :  { %457 = vrot.lane.b32.xlu1 %v455_v28, %s1523_s1  ;;  %v798_v28 = vsel %vm797_vm14, 1, %v1521_v8 }
 0x9ac   :  { %v471_v34 = vpop.permute.xlu0 %470 }
 0x9ad   :  { %vm472_vm9 = vcmp.eq.s32.totalorder %v471_v34, 1 }
 0xa10   :  { %v458_v31 = vpop.permute.xlu1 %457 }
 0xa11   :  { %v460_v32 = vadd.f32 %v458_v31, %v450_v30 }
 0xa13   :  { %1482 = vtanh.f32 %v460_v32  ;;  %v474_v51 = vsel %vm472_vm9, %v460_v32, %v364_v29 }
 0xa1d   :  { %v1483_v33 = vpop.eup %1482 }
 0xa1e   :  { %463 = vrot.lane.b32.xlu1 %v1483_v33, %s1522_s20 }
 0xa90   :  { %v464_v35 = vpop.permute.xlu1 %463 }
 0xa91   :  { %v466_v36 = vmul.f32 %v1481_v26, %v464_v35 }
 0xa93   :  { %v473_v37 = vsel %vm472_vm9, %v466_v36, %v363_v15 }
 0xa94   :  { %478 = vrot.lane.b32.xlu0 %v473_v37, %s1523_s1 }
 0xb06   :  { %v479_v38 = vpop.permute.xlu0 %478 }
 0xb07   :  { %1308 = vmatmul.mubr.msk.f32.vlgmr.msra.gmra.mrb[4].mxu0 %vm38_vm3, %v479_v38 }
 0xb08   :  { %1416 = vmatpush3.bf16.msra.mxu0 %v1586_v5  ;;  %1329 = vmatprep.mubr.msk.f32.mxu0 %vm1519_vm0, %v1520_v4 }
 0xb09   :  { %1417 = vmatprep.subr.bf16.mxu0 %v1518_v0 }
 0xb0c   :  { %1419 = vmatpush3.bf16.msra.mxu0 %v1595_v7 }
 0xb0d   :  { %1426 = vmatprep.subr.bf16.mxu0 %v1518_v0 }
 0xbda   :  { %v548_v40 = vpop.f32.mrb[4].mxu0 }
 0xbdb   :  { %v552_v41 = vadd.f32 %v1182_v39, %v548_v40  ;;  %v1309_v42 = vpop.f32.mrb[5].mxu0 }
 0xbdd   :  { %1484 = vtanh.f32 %v552_v41  ;;  %v1184_v45 = vmul.f32 -1.442695, %v552_v41 }
 0xbdf   :  { %1486 = vpow2.f32 %v1184_v45  ;;  %v1191_v45 = vld [vmem:[%s1810_s0 + $0x38] sm:$0xff] }
 0xbe7   :  { %v1485_v43 = vpop.eup %1484 }
 0xbe8   :  { %562 = vrot.lane.b32.xlu1 %v1485_v43, %s1522_s20 }
 0xbe9   :  { %v1487_v46 = vpop.eup %1486 }
 0xbea   :  { %v556_v47 = vadd.f32 1.0, %v1487_v46 }
 0xbec   :  { %580 = vperm.xlu1 %1450, %v578_v44   ;;  %1488 = vrcp.f32 %v556_v47 }
 0xbf6   :  { %v1489_v48 = vpop.eup %1488 }
 0xbf7   :  { %v560_v52 = vmul.f32 %v1489_v48, %v474_v51 }
 0xc5a   :  { %v563_v49 = vpop.permute.xlu1 %562 }
 0xc5b   :  { %v565_v50 = vmul.f32 %v1489_v48, %v563_v49 }
 0xc5d   :  { %567 = vrot.lane.b32.xlu0 %v565_v50, %s1523_s1  ;;  %v908_v50 = vsel %vm907_vm1, 1, %v1521_v8  ;;  %v915_v8 = vld [vmem:[%s1811_s4] sm:$0xff] }
 0xc6b   :  { %v581_v56 = vpop.permute.xlu1 %580 }
 0xc6c   :  { %vm582_vm11 = vcmp.eq.s32.totalorder %v581_v56, 1 }
 0xccf   :  { %v568_v53 = vpop.permute.xlu0 %567 }
 0xcd0   :  { %v570_v54 = vadd.f32 %v568_v53, %v560_v52 }
 0xcd2   :  { %1490 = vtanh.f32 %v570_v54  ;;  %v584_v13 = vsel %vm582_vm11, %v570_v54, %v474_v51 }
 0xcdc   :  { %v1491_v55 = vpop.eup %1490 }
 0xcdd   :  { %573 = vrot.lane.b32.xlu0 %v1491_v55, %s1522_s20 }
 0xd4f   :  { %v574_v57 = vpop.permute.xlu0 %573 }
 0xd50   :  { %v576_v58 = vmul.f32 %v1489_v48, %v574_v57 }
 0xd52   :  { %v583_v59 = vsel %vm582_vm11, %v576_v58, %v473_v37 }
 0xd53   :  { %588 = vrot.lane.b32.xlu1 %v583_v59, %s1523_s1 }
 0xdc5   :  { %v589_v60 = vpop.permute.xlu1 %588 }
 0xdc6   :  { %1319 = vmatmul.mubr.msk.f32.vlgmr.msra.gmra.mrb[4].mxu1 %vm38_vm3, %v589_v60  ;;  %v916_v60 = vld [vmem:[%s1811_s4 + $0x8] sm:$0xff] }
 0xdc7   :  { %1422 = vmatpush3.bf16.msra.mxu1 %v1586_v5  ;;  %1340 = vmatprep.mubr.msk.f32.mxu1 %vm1519_vm0, %v1520_v4 }
 0xdc8   :  { %1423 = vmatprep.subr.bf16.mxu1 %v1518_v0 }
 0xdcb   :  { %1425 = vmatpush3.bf16.msra.mxu1 %v1595_v7 }
 0xdcc   :  { %1432 = vmatprep.subr.bf16.mxu1 %v1518_v0 }
 0xe99   :  { %v658_v62 = vpop.f32.mrb[4].mxu1 }
 0xe9a   :  { %v662_v63 = vadd.f32 %v1185_v61, %v658_v62  ;;  %v1320_v1 = vpop.f32.mrb[5].mxu1  ;;  %v917_v61 = vld [vmem:[%s1811_s4 + $0x10] sm:$0xff]  ;;  %v1433_v62 = vpack.c.bf16 %v916_v60, %v915_v8 }
 0xe9b   :  { %v923_v1 = vld [vmem:[%s1812_s5] sm:$0xff] }
 0xe9c   :  { %1492 = vtanh.f32 %v662_v63  ;;  %v1187_v3 = vmul.f32 -1.442695, %v662_v63  ;;  %v918_v63 = vld [vmem:[%s1811_s4 + $0x18] sm:$0xff] }
 0xe9e   :  { %1494 = vpow2.f32 %v1187_v3 }
 0xea6   :  { %v1493_v5 = vpop.eup %1492 }
 0xea7   :  { %672 = vrot.lane.b32.xlu0 %v1493_v5, %s1522_s20  ;;  %v924_v5 = vld [vmem:[%s1812_s5 + $0x8] sm:$0xff] }
 0xea8   :  { %v1495_v7 = vpop.eup %1494  ;;  %v1427_v3 = vpack.c.bf16 %v924_v5, %v923_v1 }
 0xea9   :  { %v666_v6 = vadd.f32 1.0, %v1495_v7  ;;  %v925_v7 = vld [vmem:[%s1812_s5 + $0x10] sm:$0xff] }
 0xeab   :  { %690 = vperm.xlu0 %1451, %v688_v2   ;;  %1496 = vrcp.f32 %v666_v6  ;;  %v1436_v2 = vpack.c.bf16 %v918_v63, %v917_v61  ;;  %v926_v6 = vld [vmem:[%s1812_s5 + $0x18] sm:$0xff] }
 0xeb5   :  { %v1497_v10 = vpop.eup %1496 }
 0xeb6   :  { %v670_v14 = vmul.f32 %v1497_v10, %v584_v13 }
 0xf19   :  { %v673_v11 = vpop.permute.xlu0 %672 }
 0xf1a   :  { %v675_v12 = vmul.f32 %v1497_v10, %v673_v11  ;;  %v920_v11 = vld [vmem:[%s1811_s4 + $0x28] sm:$0xff] }
 0xf1c   :  { %677 = vrot.lane.b32.xlu1 %v675_v12, %s1523_s1  ;;  %v1430_v12 = vpack.c.bf16 %v926_v6, %v925_v7 }
 0xf2a   :  { %v691_v18 = vpop.permute.xlu0 %690 }
 0xf2b   :  { %vm692_vm13 = vcmp.eq.s32.totalorder %v691_v18, 1  ;;  %v914_v18 = vld [vmem:[%s1813_s3] sm:$0xff] }
 0xf8e   :  { %v678_v15 = vpop.permute.xlu1 %677 }
 0xf8f   :  { %v680_v16 = vadd.f32 %v678_v15, %v670_v14  ;;  %v921_v15 = vld [vmem:[%s1811_s4 + $0x30] sm:$0xff] }
 0xf91   :  { %1498 = vtanh.f32 %v680_v16  ;;  %v694_v35 = vsel %vm692_vm13, %v680_v16, %v584_v13  ;;  %v922_v16 = vld [vmem:[%s1811_s4 + $0x38] sm:$0xff] }
 0xf9b   :  { %v1499_v17 = vpop.eup %1498 }
 0xf9c   :  { %683 = vrot.lane.b32.xlu1 %v1499_v17, %s1522_s20  ;;  %v1442_v17 = vpack.c.bf16 %v922_v16, %v921_v15 }
0x100e   :  { %v684_v19 = vpop.permute.xlu1 %683 }
0x100f   :  { %v686_v20 = vmul.f32 %v1497_v10, %v684_v19  ;;  %v919_v10 = vld [vmem:[%s1811_s4 + $0x20] sm:$0xff] }
0x1010   :  { %v1439_v13 = vpack.c.bf16 %v920_v11, %v919_v10 }
0x1011   :  { %v693_v21 = vsel %vm692_vm13, %v686_v20, %v583_v59 }
0x1012   :  { %698 = vrot.lane.b32.xlu0 %v693_v21, %s1523_s1 }
0x1084   :  { %v699_v22 = vpop.permute.xlu0 %698 }
0x1085   :  { %1330 = vmatmul.mubr.msk.f32.vlgmr.msra.gmra.mrb[6].mxu0 %vm38_vm3, %v699_v22 }
0x1086   :  { %1351 = vmatprep.mubr.msk.f32.mxu0 %vm1519_vm0, %v1520_v4  ;;  %1428 = vmatpush3.bf16.msra.mxu0 %v1427_v3 }
0x1087   :  { %1429 = vmatprep.subr.bf16.mxu0 %v1518_v0 }
0x108a   :  { %1431 = vmatpush3.bf16.msra.mxu0 %v1430_v12 }
0x108b   :  { %1373 = vmatprep.subr.mxu0 %v1520_v4 }
0x1158   :  { %v768_v24 = vpop.f32.mrb[6].mxu0 }
0x1159   :  { %v772_v25 = vadd.f32 %v1188_v23, %v768_v24  ;;  %v1331_v26 = vpop.f32.mrb[7].mxu0 }
0x115b   :  { %1500 = vtanh.f32 %v772_v25  ;;  %v1190_v29 = vmul.f32 -1.442695, %v772_v25 }
0x115d   :  { %1502 = vpow2.f32 %v1190_v29 }
0x1165   :  { %v1501_v27 = vpop.eup %1500 }
0x1166   :  { %782 = vrot.lane.b32.xlu1 %v1501_v27, %s1522_s20  ;;  %v1196_v27 = vld [vmem:[%s1815_s7] ss:$0 sm:$0xff] }
0x1167   :  { %v1503_v30 = vpop.eup %1502 }
0x1168   :  { %v776_v31 = vadd.f32 1.0, %v1503_v30 }
0x116a   :  { %800 = vperm.xlu1 %1450, %v798_v28   ;;  %1504 = vrcp.f32 %v776_v31 }
0x1174   :  { %v1505_v32 = vpop.eup %1504 }
0x1175   :  { %v780_v36 = vmul.f32 %v1505_v32, %v694_v35 }
0x11d8   :  { %v783_v33 = vpop.permute.xlu1 %782 }
0x11d9   :  { %v785_v34 = vmul.f32 %v1505_v32, %v783_v33 }
0x11db   :  { %787 = vrot.lane.b32.xlu0 %v785_v34, %s1523_s1 }
0x11e9   :  { %v801_v40 = vpop.permute.xlu1 %800 }
0x11ea   :  { %vm802_vm15 = vcmp.eq.s32.totalorder %v801_v40, 1 }
0x124d   :  { %v788_v37 = vpop.permute.xlu0 %787 }
0x124e   :  { %v790_v38 = vadd.f32 %v788_v37, %v780_v36 }
0x1250   :  { %1506 = vtanh.f32 %v790_v38  ;;  %v804_v57 = vsel %vm802_vm15, %v790_v38, %v694_v35 }
0x125a   :  { %v1507_v39 = vpop.eup %1506 }
0x125b   :  { %793 = vrot.lane.b32.xlu0 %v1507_v39, %s1522_s20 }
0x12cd   :  { %v794_v41 = vpop.permute.xlu0 %793 }
0x12ce   :  { %v796_v42 = vmul.f32 %v1505_v32, %v794_v41 }
0x12d0   :  { %v1731_v43 = vsel %vm802_vm15, %v796_v42, %v693_v21 }
0x12d1   :  { %808 = vrot.lane.b32.xlu1 %v1731_v43, %s1523_s1 }
0x1343   :  { %v809_v44 = vpop.permute.xlu1 %808 }
0x1344   :  { %1341 = vmatmul.mubr.msk.f32.vlgmr.msra.gmra.mrb[6].mxu1 %vm38_vm3, %v809_v44 }
0x1345   :  { %1370 = vmatprep.mubr.msk.f32.mxu1 %vm1519_vm0, %v1520_v4  ;;  %1434 = vmatpush3.bf16.msra.mxu1 %v1433_v62 }
0x1346   :  { %1435 = vmatprep.subr.bf16.mxu1 %v1518_v0 }
0x1349   :  { %1437 = vmatpush3.bf16.msra.mxu1 %v1436_v2 }
0x134a   :  { %1438 = vmatprep.subr.bf16.mxu1 %v1518_v0 }
0x134d   :  { %1440 = vmatpush3.bf16.msra.mxu1 %v1439_v13 }
0x134e   :  { %1441 = vmatprep.subr.bf16.mxu1 %v1518_v0  ;;  %v1085_v0 = vld [vmem:[%s1814_s6] sm:$0xff] }
0x1351   :  { %1443 = vmatpush3.bf16.msra.mxu1 %v1442_v17 }
0x1354   :  { %1371 = vmatmul.mubr.msk.f32.vlgmr.msra.gmra.mrb[8].mxu1 %vm1002_vm2, %v914_v18 }
0x1417   :  { %v878_v46 = vpop.f32.mrb[6].mxu1 }
0x1418   :  { %v882_v47 = vadd.f32 %v1191_v45, %v878_v46  ;;  %v1342_v48 = vpop.f32.mrb[7].mxu1 }
0x141a   :  { %1508 = vtanh.f32 %v882_v47  ;;  %v1193_v51 = vmul.f32 -1.442695, %v882_v47 }
0x141c   :  { %1510 = vpow2.f32 %v1193_v51 }
0x1424   :  { %v1509_v49 = vpop.eup %1508 }
0x1425   :  { %892 = vrot.lane.b32.xlu0 %v1509_v49, %s1522_s20 }
0x1426   :  { %v1511_v52 = vpop.eup %1510 }
0x1427   :  { %v886_v53 = vadd.f32 1.0, %v1511_v52  ;;  %v1072_v23 = vpop.f32.mrb[8].mxu1 }
0x1428   :  { %v1372_v24 = vpop.f32.mrb[9].mxu1 }
0x1429   :  { %910 = vperm.xlu0 %1451, %v908_v50   ;;  %1512 = vrcp.f32 %v886_v53 }
0x1433   :  { %v1513_v54 = vpop.eup %1512 }
0x1434   :  { %v890_v58 = vmul.f32 %v1513_v54, %v804_v57 }
0x1497   :  { %v893_v55 = vpop.permute.xlu0 %892 }
0x1498   :  { %v895_v56 = vmul.f32 %v1513_v54, %v893_v55 }
0x149a   :  { %897 = vrot.lane.b32.xlu1 %v895_v56, %s1523_s1 }
0x14a8   :  { %v911_v19 = vpop.permute.xlu0 %910 }
0x14a9   :  { %vm912_vm4 = vcmp.eq.s32.totalorder %v911_v19, 1 }
0x150c   :  { %v898_v9 = vpop.permute.xlu1 %897 }
0x150d   :  { %v900_v59 = vadd.f32 %v898_v9, %v890_v58 }
0x150f   :  { %1514 = vtanh.f32 %v900_v59 }
0x1519   :  { %v1515_v14 = vpop.eup %1514 }
0x151a   :  { %903 = vrot.lane.b32.xlu1 %v1515_v14, %s1522_s20 }
0x158c   :  { %v904_v20 = vpop.permute.xlu1 %903 }
0x158d   :  { %v906_v21 = vmul.f32 %v1513_v54, %v904_v20 }
0x158f   :  { %v913_v22 = vsel %vm912_vm4, %v906_v21, %v1731_v43 }
0x1590   :  { %928 = vrot.lane.b32.xlu0 %v913_v22, %s1523_s1 }
0x1602   :  { %v929_v25 = vpop.permute.xlu0 %928 }
0x1603   :  { %1352 = vmatmul.mubr.msk.f32.vlgmr.msra.gmra.mrb[8].mxu0 %vm38_vm3, %v929_v25 }
0x1604   :  { %1375 = vmatprep.mubr.msk.f32.mxu0 %vm1519_vm0, %v1520_v4  ;;  %1374 = vmatpush3.msra.mxu0 %v1085_v0  ;;  %v1197_v4 = vld [vmem:[%s1816_s8] ss:$0 sm:$0xff] }
0x16d6   :  { %v998_v26 = vpop.f32.mrb[8].mxu0 }
0x16d7   :  { %v1073_v28 = vadd.f32 %v1072_v23, %v998_v26  ;;  %v1353_v29 = vpop.f32.mrb[9].mxu0 }
0x16d9   :  { %v1083_v30 = vadd.f32 %v1196_v27, %v1073_v28 }
0x16db   :  { %1516 = vtanh.f32 %v1083_v30 }
0x16e5   :  { %v1517_v31 = vpop.eup %1516 }
0x16e6   :  { %1376 = vmatmul.mubr.msk.f32.vlgmr.msra.gmra.mrb[10].mxu0 %vm1093_vm5, %v1517_v31 }
0x17b9   :  { %v1163_v32 = vpop.f32.mrb[10].mxu0 }
0x17ba   :  { %v1164_v33 = vadd.f32 %v1197_v4, %v1163_v32  ;;  %v1377_v34 = vpop.f32.mrb[11].mxu0 }
0x17bc   :  { %1167 = vst.msk [vmem:[%s1817_s9] sm:$0xff] %vm1093_vm5, %v1164_v33 }

</bundles_post_ra>
